<compile_context>
chip_gen: v5e
topology: v5e:2x2
jax: 0.10.0
libtpu: 0.0.40
codegen_flags: <defaults>
</compile_context>

<pallas_src>
import functools

import jax
import jax.numpy as jnp
from jax.experimental import pallas as pl
from jax.experimental.pallas import tpu as pltpu


OUT_LOGITS = 2   # real logits of the final nn.Linear(hidden, 2)
OUT_W = 8        # narrow padded output width (32 B/row writeback)


def _round_up(x, m):
    return ((x + m - 1) // m) * m


def _mlp_kernel(emb_ref, act_ref, w1e_ref, w1a_ref, b1_ref, w2_ref, b2_ref, o_ref):
    # emb_ref: (TB, E) bf16      act_ref: (TB, A) bf16
    # w1e_ref: (E, H)  bf16      w1a_ref: (A, H)  bf16    b1_ref: (1, H)     f32
    # w2_ref:  (H, OUT_W) bf16 (zero-padded past col 2)   b2_ref: (1, OUT_W) f32
    # o_ref:   (TB, OUT_W) f32
    h = jnp.dot(emb_ref[...], w1e_ref[...], preferred_element_type=jnp.float32)
    h = h + jnp.dot(act_ref[...], w1a_ref[...], preferred_element_type=jnp.float32)
    h = jnp.maximum(h + b1_ref[...], 0.0)  # bias + ReLU in f32; Dropout is identity (eval)
    out = jnp.dot(h.astype(w2_ref.dtype), w2_ref[...],
                  preferred_element_type=jnp.float32)
    o_ref[...] = (out + b2_ref[...]).astype(o_ref.dtype)


def prepare_params(params, embedding_dim):
    """One-time param preprocessing (split / cast / pad), hoisted out of forward."""
    w1, b1, w2, b2 = params["w1"], params["b1"], params["w2"], params["b2"]
    E = embedding_dim
    return {
        "w1e": w1[:E].astype(jnp.bfloat16),
        "w1a": w1[E:].astype(jnp.bfloat16),
        "b1": b1.astype(jnp.float32).reshape(1, -1),
        "w2": jnp.pad(w2.astype(jnp.bfloat16), ((0, 0), (0, OUT_W - w2.shape[1]))),
        "b2": jnp.pad(b2.astype(jnp.float32).reshape(1, -1),
                      ((0, 0), (0, OUT_W - b2.shape[1]))),
    }


@functools.partial(jax.jit, static_argnames=("max_tile",))
def sequence_decision_forward(embeddings, prev_actions, prepared, *, max_tile=8192):
    """Replicates SequenceDecisionNetwork.forward semantics (eval mode)."""
    # --- dim / batch-size adjustment (shape logic resolves at trace time) ---
    if embeddings.ndim == 1:
        embeddings = embeddings[None, :]
    if prev_actions.ndim == 1:
        prev_actions = prev_actions[None, :]

    be, ba = embeddings.shape[0], prev_actions.shape[0]
    if be != ba:
        if be == 1:
            embeddings = jnp.broadcast_to(embeddings, (ba, embeddings.shape[1]))
        elif ba == 1:
            prev_actions = jnp.broadcast_to(prev_actions, (be, prev_actions.shape[1]))
        else:
            mb = min(be, ba)
            embeddings = embeddings[:mb]
            prev_actions = prev_actions[:mb]

    B, E = embeddings.shape
    A = prev_actions.shape[1]
    w1e, w1a, b1 = prepared["w1e"], prepared["w1a"], prepared["b1"]
    w2, b2 = prepared["w2"], prepared["b2"]
    H = w1e.shape[1]

    # --- batch tiling --------------------------------------------------------
    B8 = _round_up(B, 8)
    if B8 >= 16:
        # Ensure >= 2 tiles whenever possible so v7x's two TensorCores both
        # get work; otherwise one large tile.
        TB = min(max_tile, _round_up((B8 + 1) // 2, 8))
    else:
        TB = B8
    B_pad = _round_up(B8, TB)
    num_tiles = B_pad // TB

    emb = embeddings.astype(jnp.bfloat16)
    act = prev_actions.astype(jnp.bfloat16)
    if B_pad != B:
        emb = jnp.pad(emb, ((0, B_pad - B), (0, 0)))
        act = jnp.pad(act, ((0, B_pad - B), (0, 0)))

    # VMEM budget: double-buffered batch tiles + double-buffered weights,
    # 2x margin, capped well below v7x's 64 MiB scoped VMEM.
    tile_bytes = 2 * TB * (E * 2 + A * 2 + OUT_W * 4)
    weight_bytes = 2 * ((E * H + A * H + H * OUT_W) * 2 + (H + OUT_W) * 4)
    vmem_limit = int(min(48 << 20, max(4 << 20, 2 * (tile_bytes + weight_bytes))))

    out_padded = pl.pallas_call(
        _mlp_kernel,
        out_shape=jax.ShapeDtypeStruct((B_pad, OUT_W), jnp.float32),
        grid=(num_tiles,),
        in_specs=[
            pl.BlockSpec((TB, E), lambda i: (i, 0)),       # embeddings tile
            pl.BlockSpec((TB, A), lambda i: (i, 0)),       # prev_actions tile
            pl.BlockSpec((E, H), lambda i: (0, 0)),        # w1[:E]  (VMEM-resident)
            pl.BlockSpec((A, H), lambda i: (0, 0)),        # w1[E:]
            pl.BlockSpec((1, H), lambda i: (0, 0)),        # b1
            pl.BlockSpec((H, OUT_W), lambda i: (0, 0)),    # w2 (padded to OUT_W)
            pl.BlockSpec((1, OUT_W), lambda i: (0, 0)),    # b2 (padded to OUT_W)
        ],
        out_specs=pl.BlockSpec((TB, OUT_W), lambda i: (i, 0)),
        compiler_params=pltpu.CompilerParams(
            dimension_semantics=("parallel",),
            vmem_limit_bytes=vmem_limit,
        ),
    )(emb, act, w1e, w1a, b1, w2, b2)

    # Drop padding rows and padded output lanes (fuses under jit).
    return out_padded[:B, :OUT_LOGITS]


def init_params(key, embedding_dim, action_size, hidden_dim=128, dtype=jnp.float32):
    """Deterministic synthetic init mirroring nn.Linear shapes."""
    in_dim = embedding_dim + action_size
    k1, k2, k3, k4 = jax.random.split(key, 4)
    # PyTorch nn.Linear default init: U(-1/sqrt(fan_in), 1/sqrt(fan_in))
    lim1 = 1.0 / jnp.sqrt(in_dim)
    lim2 = 1.0 / jnp.sqrt(hidden_dim)
    return {
        "w1": jax.random.uniform(k1, (in_dim, hidden_dim), dtype, -lim1, lim1),
        "b1": jax.random.uniform(k2, (1, hidden_dim), dtype, -lim1, lim1),
        "w2": jax.random.uniform(k3, (hidden_dim, OUT_LOGITS), dtype, -lim2, lim2),
        "b2": jax.random.uniform(k4, (1, OUT_LOGITS), dtype, -lim2, lim2),
    }


if __name__ == "__main__":
    embedding_dim = 32
    action_size = 8
    hidden_dim = 128
    batch = 2

    key = jax.random.PRNGKey(0)
    kp, ke, ka = jax.random.split(key, 3)
    params = init_params(kp, embedding_dim, action_size, hidden_dim)
    prepared = prepare_params(params, embedding_dim)   # one-time preprocessing

    embeddings = jax.random.normal(ke, (batch, embedding_dim), jnp.float32)
    prev_actions = jax.random.normal(ka, (batch, action_size), jnp.float32)

    logits = sequence_decision_forward(embeddings, prev_actions, prepared)
    logits = jax.block_until_ready(logits)

    # Reference check (plain JAX, f32). bf16 matmul inputs -> loose tolerance.
    combined = jnp.concatenate([embeddings, prev_actions], axis=1)
    ref = jnp.maximum(combined @ params["w1"] + params["b1"], 0.0) @ params["w2"] + params["b2"]
    assert logits.shape == (batch, OUT_LOGITS), logits.shape
    assert jnp.allclose(logits, ref, atol=3e-2, rtol=3e-2), (logits, ref)

    print("KERNEL_OK")
</pallas_src>

<mosaic_0001>
module attributes {stable_mosaic.version = 11 : i64} {
  func.func @_mlp_kernel(%arg0: i32, %arg1: memref<8x32xbf16, #tpu.memory_space<vmem>>, %arg2: memref<8x8xbf16, #tpu.memory_space<vmem>>, %arg3: memref<32x128xbf16, #tpu.memory_space<vmem>>, %arg4: memref<8x128xbf16, #tpu.memory_space<vmem>>, %arg5: memref<1x128xf32, #tpu.memory_space<vmem>>, %arg6: memref<128x8xbf16, #tpu.memory_space<vmem>>, %arg7: memref<1x8xf32, #tpu.memory_space<vmem>>, %arg8: memref<8x8xf32, #tpu.memory_space<vmem>>) attributes {dimension_semantics = [#tpu.dimension_semantics<parallel>], iteration_bounds = array<i64: 1>, scalar_prefetch = 0 : i64, scratch_operands = 0 : i64, tpu.core_type = #tpu.core_type<tc>, window_params = [{transform_indices = @transform_0, window_bounds = array<i64: 8, 32>}, {transform_indices = @transform_1, window_bounds = array<i64: 8, 8>}, {pipeline_mode = #tpu.pipeline_mode<synchronous>, transform_indices = @transform_2, window_bounds = array<i64: 32, 128>}, {pipeline_mode = #tpu.pipeline_mode<synchronous>, transform_indices = @transform_3, window_bounds = array<i64: 8, 128>}, {pipeline_mode = #tpu.pipeline_mode<synchronous>, transform_indices = @transform_4, window_bounds = array<i64: 1, 128>}, {pipeline_mode = #tpu.pipeline_mode<synchronous>, transform_indices = @transform_5, window_bounds = array<i64: 128, 8>}, {pipeline_mode = #tpu.pipeline_mode<synchronous>, transform_indices = @transform_6, window_bounds = array<i64: 1, 8>}, {transform_indices = @transform_7, window_bounds = array<i64: 8, 8>}]} {
    %c0 = arith.constant 0 : index
    %c0_0 = arith.constant 0 : index
    %0 = vector.load %arg1[%c0, %c0_0] : memref<8x32xbf16, #tpu.memory_space<vmem>>, vector<8x32xbf16>
    %c0_1 = arith.constant 0 : index
    %c0_2 = arith.constant 0 : index
    %1 = vector.load %arg3[%c0_1, %c0_2] : memref<32x128xbf16, #tpu.memory_space<vmem>>, vector<32x128xbf16>
    %cst = arith.constant dense<0.000000e+00> : vector<8x128xf32>
    %2 = tpu.matmul %0, %1, %cst {dimension_numbers = #tpu.dot_dimension_numbers<[1], [0], [0], [1], [0, 0, 1, 1], [], []>} : vector<8x32xbf16>, vector<32x128xbf16>, vector<8x128xf32> -> vector<8x128xf32>
    %c0_3 = arith.constant 0 : index
    %c0_4 = arith.constant 0 : index
    %3 = vector.load %arg2[%c0_3, %c0_4] : memref<8x8xbf16, #tpu.memory_space<vmem>>, vector<8x8xbf16>
    %c0_5 = arith.constant 0 : index
    %c0_6 = arith.constant 0 : index
    %4 = vector.load %arg4[%c0_5, %c0_6] : memref<8x128xbf16, #tpu.memory_space<vmem>>, vector<8x128xbf16>
    %cst_7 = arith.constant dense<0.000000e+00> : vector<8x128xf32>
    %5 = tpu.matmul %3, %4, %cst_7 {dimension_numbers = #tpu.dot_dimension_numbers<[1], [0], [0], [1], [0, 0, 1, 1], [], []>} : vector<8x8xbf16>, vector<8x128xbf16>, vector<8x128xf32> -> vector<8x128xf32>
    %6 = arith.addf %2, %5 : vector<8x128xf32>
    %c0_8 = arith.constant 0 : index
    %c0_9 = arith.constant 0 : index
    %7 = vector.load %arg5[%c0_8, %c0_9] : memref<1x128xf32, #tpu.memory_space<vmem>>, vector<1x128xf32>
    %8 = vector.broadcast %7 : vector<1x128xf32> to vector<8x128xf32>
    %9 = arith.addf %6, %8 : vector<8x128xf32>
    %cst_10 = arith.constant 0.000000e+00 : f32
    %10 = vector.broadcast %cst_10 : f32 to vector<8x128xf32>
    %11 = arith.maximumf %9, %10 : vector<8x128xf32>
    %12 = arith.truncf %11 : vector<8x128xf32> to vector<8x128xbf16>
    %c0_11 = arith.constant 0 : index
    %c0_12 = arith.constant 0 : index
    %13 = vector.load %arg6[%c0_11, %c0_12] : memref<128x8xbf16, #tpu.memory_space<vmem>>, vector<128x8xbf16>
    %cst_13 = arith.constant dense<0.000000e+00> : vector<8x8xf32>
    %14 = tpu.matmul %12, %13, %cst_13 {dimension_numbers = #tpu.dot_dimension_numbers<[1], [0], [0], [1], [0, 0, 1, 1], [], []>} : vector<8x128xbf16>, vector<128x8xbf16>, vector<8x8xf32> -> vector<8x8xf32>
    %c0_14 = arith.constant 0 : index
    %c0_15 = arith.constant 0 : index
    %15 = vector.load %arg7[%c0_14, %c0_15] : memref<1x8xf32, #tpu.memory_space<vmem>>, vector<1x8xf32>
    %16 = vector.broadcast %15 : vector<1x8xf32> to vector<8x8xf32>
    %17 = arith.addf %14, %16 : vector<8x8xf32>
    %c0_16 = arith.constant 0 : index
    %c0_17 = arith.constant 0 : index
    %18 = vector.load %arg8[%c0_16, %c0_17] : memref<8x8xf32, #tpu.memory_space<vmem>>, vector<8x8xf32>
    tpu.vector_store %arg8[%c0_16, %c0_17], %17 {strides = array<i32>} : memref<8x8xf32, #tpu.memory_space<vmem>>, vector<8x8xf32>,
    return
  }
  func.func @transform_0(%arg0: i32) -> (i32, i32) {
    %c0_i32 = arith.constant 0 : i32
    %c0_i32_0 = arith.constant 0 : i32
    return %arg0, %c0_i32 : i32, i32
  }
  func.func @transform_1(%arg0: i32) -> (i32, i32) {
    %c0_i32 = arith.constant 0 : i32
    %c0_i32_0 = arith.constant 0 : i32
    return %arg0, %c0_i32 : i32, i32
  }
  func.func @transform_2(%arg0: i32) -> (i32, i32) {
    %c0_i32 = arith.constant 0 : i32
    %c0_i32_0 = arith.constant 0 : i32
    %c0_i32_1 = arith.constant 0 : i32
    return %c0_i32, %c0_i32_0 : i32, i32
  }
  func.func @transform_3(%arg0: i32) -> (i32, i32) {
    %c0_i32 = arith.constant 0 : i32
    %c0_i32_0 = arith.constant 0 : i32
    %c0_i32_1 = arith.constant 0 : i32
    return %c0_i32, %c0_i32_0 : i32, i32
  }
  func.func @transform_4(%arg0: i32) -> (i32, i32) {
    %c0_i32 = arith.constant 0 : i32
    %c0_i32_0 = arith.constant 0 : i32
    %c0_i32_1 = arith.constant 0 : i32
    return %c0_i32, %c0_i32_0 : i32, i32
  }
  func.func @transform_5(%arg0: i32) -> (i32, i32) {
    %c0_i32 = arith.constant 0 : i32
    %c0_i32_0 = arith.constant 0 : i32
    %c0_i32_1 = arith.constant 0 : i32
    return %c0_i32, %c0_i32_0 : i32, i32
  }
  func.func @transform_6(%arg0: i32) -> (i32, i32) {
    %c0_i32 = arith.constant 0 : i32
    %c0_i32_0 = arith.constant 0 : i32
    %c0_i32_1 = arith.constant 0 : i32
    return %c0_i32, %c0_i32_0 : i32, i32
  }
  func.func @transform_7(%arg0: i32) -> (i32, i32) {
    %c0_i32 = arith.constant 0 : i32
    %c0_i32_0 = arith.constant 0 : i32
    return %arg0, %c0_i32 : i32, i32
  }
}

</mosaic_0001>

<bundles_post_ra>
// kernel: sequence_decision_forward.1
= control target key start
LH: loop header
LB: loop body
LE: loop exit
PB: predicated region body
PF: predicated region fallthrough
CT: control target
= control target key end

     0   :  { %vm38_vm0 = vcmask 1043456   ;;  %vm34_vm1 = vcmask 64512   ;;  %vm67_vm2 = vcmask 261120   ;;  %s321_s3 = inlined_call_operand.vmem [shape: bf16[8,128], index: 3, kind: input, shape index: {}]   ;;  %s322_s2 = inlined_call_operand.vmem [shape: bf16[32,128], index: 2, kind: input, shape index: {}]   ;;  %s323_s1 = inlined_call_operand.vmem [shape: bf16[8,8], index: 1, kind: input, shape index: {}]   ;;  %s324_s5 = inlined_call_operand.vmem [shape: bf16[128,8], index: 5, kind: input, shape index: {}]   ;;  %s325_s0 = inlined_call_operand.vmem [shape: bf16[8,32], index: 0, kind: input, shape index: {}]   ;;  %s326_s4 = inlined_call_operand.vmem [shape: f32[1,128], index: 4, kind: input, shape index: {}]   ;;  %s327_s6 = inlined_call_operand.vmem [shape: f32[1,8], index: 6, kind: input, shape index: {}]   ;;  %s328_s7 = inlined_call_operand.vmem [shape: f32[8,8], index: 7, kind: output, shape index: {}]  }
   0x1   :  { %v33_v0 = vld [vmem:[%s321_s3] sm:$0xf]  ;;  %v220_v1 = vld [vmem:[%s322_s2 + $0x8] sm:$0xff]  ;;  %v228_v3 = vld [vmem:[%s324_s5 + $0x38] sm:$0xff] }
   0x2   :  { %v40_v2 = vsel %vm38_vm0, %v33_v0, 0  ;;  %77 = vmatpush.bf16.msra.mxu1 %v220_v1  ;;  %v32_v4 = vld [vmem:[%s323_s1] sm:$0xf]  ;;  %159 = vmatpush.bf16.msra.mxu2 %v228_v3  ;;  %v227_v6 = vld [vmem:[%s324_s5 + $0x30] sm:$0xff]  ;;  %v226_v8 = vld [vmem:[%s324_s5 + $0x28] sm:$0xff] }
   0x3   :  { %49 = vmatpush.bf16.msra.mxu0 %v40_v2  ;;  %v219_v5 = vld [vmem:[%s322_s2] sm:$0xff]  ;;  %v224_v10 = vld [vmem:[%s324_s5 + $0x18] sm:$0xff]  ;;  %v223_v11 = vld [vmem:[%s324_s5 + $0x10] sm:$0xff] }
   0x4   :  { %v27_v7 = vld [vmem:[%s325_s0] sm:$0xf]  ;;  %v222_v12 = vld [vmem:[%s324_s5 + $0x8] sm:$0xff] }
   0x5   :  { %v225_v9 = vld [vmem:[%s324_s5 + $0x20] sm:$0xff] }
   0x6   :  { %177 = vmatmul.msk.bf16.vlgmr.msra.gmra.mxu0 %vm34_vm1, %v32_v4  ;;  %78 = vmatpush.bf16.msra.mxu1 %v219_v5  ;;  %v221_v13 = vld [vmem:[%s324_s5] sm:$0xff] }
   0x7   :  { %160 = vmatpush.bf16.msra.mxu2 %v227_v6  ;;  %v229_v15 = vld [vmem:[%s326_s4] ss:$0 sm:$0xff] }
   0x8   :  { %v230_v23 = vld [vmem:[%s327_s6] ss:$0 sm:$0xff] }
   0x9   :  { %186 = vmatmul.msk.bf16.vlgmr.msra.gmra.mxu1 %vm67_vm2, %v27_v7 }
   0xb   :  { %161 = vmatpush.bf16.msra.mxu2 %v226_v8 }
   0xf   :  { %162 = vmatpush.bf16.msra.mxu2 %v225_v9 }
  0x13   :  { %163 = vmatpush.bf16.msra.mxu2 %v224_v10 }
  0x17   :  { %164 = vmatpush.bf16.msra.mxu2 %v223_v11 }
  0x1b   :  { %165 = vmatpush.bf16.msra.mxu2 %v222_v12 }
  0x1f   :  { %166 = vmatpush.bf16.msra.mxu2 %v221_v13 }
  0x83   :  { %v51_v14 = vpop.f32.mrf.mxu0 }
  0x86   :  { %v80_v16 = vpop.f32.mrf.mxu1 }
  0x87   :  { %v81_v17 = vadd.f32 %v80_v16, %v51_v14 }
  0x89   :  { %v88_v18 = vadd.f32 %v229_v15, %v81_v17 }
  0x8b   :  { %v53_v19 = vpop.f32.mrf.mxu0  ;;  %v89_v20 = vmax.f32 %v88_v18, 0.0 }
  0x8d   :  { %v90_v21 = vpack.c.bf16 %v89_v20, %v89_v20 }
  0x8e   :  { %v82_v22 = vpop.f32.mrf.mxu1 }
  0x8f   :  { %167 = vmatmul.bf16.vlgmr.msra.gmra.mxu2 %v90_v21 }
 0x112   :  { %v168_v24 = vpop.f32.mrf.mxu2 }
 0x113   :  { %v169_v25 = vadd.f32 %v230_v23, %v168_v24 }
 0x115   :  { %172 = vst.msk [vmem:[%s328_s7] sm:$0xff] %vm34_vm1, %v169_v25 }
 0x11a   :  { %v170_v26 = vpop.f32.mrf.mxu2 }

</bundles_post_ra>
